<compile_context>
chip_gen: v7x
topology: tpu7x:2x2x1
jax: 0.10.0
libtpu: 0.0.40
codegen_flags: <defaults>
</compile_context>

<pallas_src>
import functools

import jax
import jax.numpy as jnp
from jax import lax
from jax.experimental import pallas as pl
from jax.experimental.pallas import tpu as pltpu


# ---------------------------------------------------------------------------
# Kernel: fused triplet loss over one batch tile, accumulated across the grid.
# ---------------------------------------------------------------------------
def _triplet_loss_kernel(a_ref, p_ref, n_ref, o_ref, acc_ref, *,
                         margin, batch, bm):
    step = pl.program_id(0)

    @pl.when(step == 0)
    def _init():
        acc_ref[...] = jnp.zeros_like(acc_ref)

    a = a_ref[...].astype(jnp.float32)           # (bm, D)
    p = p_ref[...].astype(jnp.float32)
    n = n_ref[...].astype(jnp.float32)

    dp = a - p
    dn = a - n
    dist_pos = jnp.sum(dp * dp, axis=1, keepdims=True)   # (bm, 1) lane reduce
    dist_neg = jnp.sum(dn * dn, axis=1, keepdims=True)   # (bm, 1)
    losses = jnp.maximum(dist_pos - dist_neg + margin, 0.0)

    # Mask out rows that are batch padding (batch was padded up to bm multiple).
    row = step * bm + lax.broadcasted_iota(jnp.int32, (bm, 1), 0)
    losses = jnp.where(row < batch, losses, 0.0)

    # Accumulate partial sum across grid steps (sublane reduce -> (1, 1)).
    acc_ref[...] += jnp.sum(losses, axis=0, keepdims=True)

    @pl.when(step == pl.num_programs(0) - 1)
    def _finalize():
        o_ref[...] = acc_ref[...]


# ---------------------------------------------------------------------------
# Wrapper
# ---------------------------------------------------------------------------
def _round_up(x, m):
    return ((x + m - 1) // m) * m


def triplet_loss(anchor, positive, negative, *, margin=1.0,
                 size_average=True, bm=512):
    """Pallas TripletLoss. anchor/positive/negative: [B, D]. Returns a scalar."""
    B, D = anchor.shape

    # Batch tile: multiple of 8 (sublane granularity), capped at `bm`.
    bm = min(bm, _round_up(B, 8))
    B_pad = _round_up(B, bm)
    if B_pad != B:
        pad = ((0, B_pad - B), (0, 0))
        anchor = jnp.pad(anchor, pad)
        positive = jnp.pad(positive, pad)
        negative = jnp.pad(negative, pad)

    grid = (B_pad // bm,)
    kernel = functools.partial(
        _triplet_loss_kernel, margin=float(margin), batch=B, bm=bm)

    cost = pl.CostEstimate(
        flops=8 * B * D,                      # diffs, squares, sums, relu
        transcendentals=0,
        bytes_accessed=3 * B * D * anchor.dtype.itemsize + 4,
    )

    total = pl.pallas_call(
        kernel,
        out_shape=jax.ShapeDtypeStruct((1, 1), jnp.float32),
        grid_spec=pltpu.PrefetchScalarGridSpec(
            num_scalar_prefetch=0,
            grid=grid,
            in_specs=[
                pl.BlockSpec((bm, D), lambda i: (i, 0)),
                pl.BlockSpec((bm, D), lambda i: (i, 0)),
                pl.BlockSpec((bm, D), lambda i: (i, 0)),
            ],
            out_specs=pl.BlockSpec((1, 1), lambda i: (0, 0)),
            scratch_shapes=[pltpu.VMEM((1, 1), jnp.float32)],
        ),
        compiler_params=pltpu.CompilerParams(
            dimension_semantics=("arbitrary",)),   # grid axis is a reduction
        cost_estimate=cost,
    )(anchor, positive, negative)

    total = total[0, 0]
    if size_average:
        return total / jnp.float32(B)
    return total


# ---------------------------------------------------------------------------
# Pure-JAX reference (mirrors the PyTorch forward exactly)
# ---------------------------------------------------------------------------
def triplet_loss_ref(anchor, positive, negative, margin=1.0, size_average=True):
    dp = jnp.sum((anchor - positive) ** 2, axis=1)
    dn = jnp.sum((anchor - negative) ** 2, axis=1)
    losses = jnp.maximum(dp - dn + margin, 0.0)
    return jnp.mean(losses) if size_average else jnp.sum(losses)


# ---------------------------------------------------------------------------
if __name__ == "__main__":
    key = jax.random.PRNGKey(0)
    ok = True

    # (8,16): tile-aligned batch; (10,32): non-divisible batch -> exercises
    # the padding + in-kernel masking path.
    for (B, D) in [(8, 16), (10, 32)]:
        key, ka, kp, kn = jax.random.split(key, 4)
        anchor = jax.random.normal(ka, (B, D), jnp.float32)
        positive = jax.random.normal(kp, (B, D), jnp.float32)
        negative = jax.random.normal(kn, (B, D), jnp.float32)

        for size_average in (True, False):
            out = triplet_loss(anchor, positive, negative,
                               margin=1.0, size_average=size_average)
            out = jax.block_until_ready(out)
            ref = triplet_loss_ref(anchor, positive, negative,
                                   margin=1.0, size_average=size_average)
            if out.shape != ():
                out = jnp.reshape(out, ())
            if not jnp.allclose(out, ref, atol=1e-5, rtol=1e-5):
                ok = False

    print("KERNEL_OK" if ok else "KERNEL_MISMATCH")
</pallas_src>

<mosaic_0001>
module attributes {stable_mosaic.version = 11 : i64} {
  func.func @_triplet_loss_kernel(%arg0: i32, %arg1: memref<8x16xf32, #tpu.memory_space<vmem>>, %arg2: memref<8x16xf32, #tpu.memory_space<vmem>>, %arg3: memref<8x16xf32, #tpu.memory_space<vmem>>, %arg4: memref<1x1xf32, #tpu.memory_space<vmem>>, %arg5: memref<1x1xf32, #tpu.memory_space<vmem>>) attributes {dimension_semantics = [#tpu.dimension_semantics<arbitrary>], iteration_bounds = array<i64: 1>, scalar_prefetch = 0 : i64, scratch_operands = 1 : i64, tpu.core_type = #tpu.core_type<tc>, window_params = [{transform_indices = @transform_0, window_bounds = array<i64: 8, 16>}, {transform_indices = @transform_1, window_bounds = array<i64: 8, 16>}, {transform_indices = @transform_2, window_bounds = array<i64: 8, 16>}, {pipeline_mode = #tpu.pipeline_mode<synchronous>, transform_indices = @transform_3, window_bounds = array<i64: 1, 1>}]} {
    %c0_i32 = arith.constant 0 : i32
    %0 = arith.cmpi eq, %arg0, %c0_i32 : i32
    %1 = arith.extui %0 : i1 to i32
    %c0_i32_0 = arith.constant 0 : i32
    %2 = arith.cmpi ne, %1, %c0_i32_0 : i32
    scf.if %2 {
      %cst_18 = arith.constant 0.000000e+00 : f32
      %35 = vector.broadcast %cst_18 : f32 to vector<1x1xf32>
      %c0_19 = arith.constant 0 : index
      %c0_20 = arith.constant 0 : index
      %36 = vector.load %arg5[%c0_19, %c0_20] : memref<1x1xf32, #tpu.memory_space<vmem>>, vector<1x1xf32>
      tpu.vector_store %arg5[%c0_19, %c0_20], %35 {strides = array<i32>} : memref<1x1xf32, #tpu.memory_space<vmem>>, vector<1x1xf32>,
    } else {
    }
    %c0 = arith.constant 0 : index
    %c0_1 = arith.constant 0 : index
    %3 = vector.load %arg1[%c0, %c0_1] : memref<8x16xf32, #tpu.memory_space<vmem>>, vector<8x16xf32>
    %c0_2 = arith.constant 0 : index
    %c0_3 = arith.constant 0 : index
    %4 = vector.load %arg2[%c0_2, %c0_3] : memref<8x16xf32, #tpu.memory_space<vmem>>, vector<8x16xf32>
    %c0_4 = arith.constant 0 : index
    %c0_5 = arith.constant 0 : index
    %5 = vector.load %arg3[%c0_4, %c0_5] : memref<8x16xf32, #tpu.memory_space<vmem>>, vector<8x16xf32>
    %6 = arith.subf %3, %4 : vector<8x16xf32>
    %7 = arith.subf %3, %5 : vector<8x16xf32>
    %8 = arith.mulf %6, %6 : vector<8x16xf32>
    %cst = arith.constant dense<0.000000e+00> : vector<8xf32>
    %9 = vector.multi_reduction <add>, %8, %cst [1] : vector<8x16xf32> to vector<8xf32>
    %10 = vector.shape_cast %9 : vector<8xf32> to vector<8x1xf32>
    %11 = arith.mulf %7, %7 : vector<8x16xf32>
    %cst_6 = arith.constant dense<0.000000e+00> : vector<8xf32>
    %12 = vector.multi_reduction <add>, %11, %cst_6 [1] : vector<8x16xf32> to vector<8xf32>
    %13 = vector.shape_cast %12 : vector<8xf32> to vector<8x1xf32>
    %14 = arith.subf %10, %13 : vector<8x1xf32>
    %cst_7 = arith.constant 1.000000e+00 : f32
    %15 = vector.broadcast %cst_7 : f32 to vector<8x1xf32>
    %16 = arith.addf %14, %15 : vector<8x1xf32>
    %cst_8 = arith.constant 0.000000e+00 : f32
    %17 = vector.broadcast %cst_8 : f32 to vector<8x1xf32>
    %18 = arith.maximumf %16, %17 : vector<8x1xf32>
    %c8_i32 = arith.constant 8 : i32
    %19 = arith.muli %arg0, %c8_i32 : i32
    %20 = tpu.iota {dimensions = array<i32: 0>} : vector<8x1xi32>
    %21 = vector.broadcast %19 : i32 to vector<8x1xi32>
    %22 = arith.addi %21, %20 : vector<8x1xi32>
    %c8_i32_9 = arith.constant 8 : i32
    %23 = vector.broadcast %c8_i32_9 : i32 to vector<8x1xi32>
    %24 = arith.cmpi slt, %22, %23 : vector<8x1xi32>
    %cst_10 = arith.constant 0.000000e+00 : f32
    %25 = vector.broadcast %cst_10 : f32 to vector<8x1xf32>
    %26 = arith.select %24, %18, %25 : vector<8x1xi1>, vector<8x1xf32>
    %c0_11 = arith.constant 0 : index
    %c0_12 = arith.constant 0 : index
    %27 = vector.load %arg5[%c0_11, %c0_12] : memref<1x1xf32, #tpu.memory_space<vmem>>, vector<1x1xf32>
    %cst_13 = arith.constant dense<0.000000e+00> : vector<1xf32>
    %28 = vector.multi_reduction <add>, %26, %cst_13 [0] : vector<8x1xf32> to vector<1xf32>
    %29 = vector.shape_cast %28 : vector<1xf32> to vector<1x1xf32>
    %30 = arith.addf %27, %29 : vector<1x1xf32>
    %c0_14 = arith.constant 0 : index
    %c0_15 = arith.constant 0 : index
    %31 = vector.load %arg5[%c0_14, %c0_15] : memref<1x1xf32, #tpu.memory_space<vmem>>, vector<1x1xf32>
    tpu.vector_store %arg5[%c0_14, %c0_15], %30 {strides = array<i32>} : memref<1x1xf32, #tpu.memory_space<vmem>>, vector<1x1xf32>,
    %c0_i32_16 = arith.constant 0 : i32
    %32 = arith.cmpi eq, %arg0, %c0_i32_16 : i32
    %33 = arith.extui %32 : i1 to i32
    %c0_i32_17 = arith.constant 0 : i32
    %34 = arith.cmpi ne, %33, %c0_i32_17 : i32
    scf.if %34 {
      %c0_18 = arith.constant 0 : index
      %c0_19 = arith.constant 0 : index
      %35 = vector.load %arg5[%c0_18, %c0_19] : memref<1x1xf32, #tpu.memory_space<vmem>>, vector<1x1xf32>
      %c0_20 = arith.constant 0 : index
      %c0_21 = arith.constant 0 : index
      %36 = vector.load %arg4[%c0_20, %c0_21] : memref<1x1xf32, #tpu.memory_space<vmem>>, vector<1x1xf32>
      tpu.vector_store %arg4[%c0_20, %c0_21], %35 {strides = array<i32>} : memref<1x1xf32, #tpu.memory_space<vmem>>, vector<1x1xf32>,
    } else {
    }
    return
  }
  func.func @transform_0(%arg0: i32) -> (i32, i32) {
    %c0_i32 = arith.constant 0 : i32
    %c0_i32_0 = arith.constant 0 : i32
    return %arg0, %c0_i32 : i32, i32
  }
  func.func @transform_1(%arg0: i32) -> (i32, i32) {
    %c0_i32 = arith.constant 0 : i32
    %c0_i32_0 = arith.constant 0 : i32
    return %arg0, %c0_i32 : i32, i32
  }
  func.func @transform_2(%arg0: i32) -> (i32, i32) {
    %c0_i32 = arith.constant 0 : i32
    %c0_i32_0 = arith.constant 0 : i32
    return %arg0, %c0_i32 : i32, i32
  }
  func.func @transform_3(%arg0: i32) -> (i32, i32) {
    %c0_i32 = arith.constant 0 : i32
    %c0_i32_0 = arith.constant 0 : i32
    %c0_i32_1 = arith.constant 0 : i32
    return %c0_i32, %c0_i32_0 : i32, i32
  }
}

</mosaic_0001>

<bundles_post_ra>
// kernel: tpu_custom_call.1
= control target key start
LH: loop header
LB: loop body
LE: loop exit
PB: predicated region body
PF: predicated region fallthrough
CT: control target
= control target key end

     0   :  { %8 = vsyncpa [#allocation4], 0  ;;  %s286_s0 = inlined_call_operand.hbm [shape: f32[8,16], index: 0, kind: input, shape index: {}]   ;;  %s287_s1 = inlined_call_operand.hbm [shape: f32[8,16], index: 1, kind: input, shape index: {}]   ;;  %s288_s2 = inlined_call_operand.hbm [shape: f32[8,16], index: 2, kind: input, shape index: {}]   ;;  %s289_s3 = inlined_call_operand.hbm [shape: f32[1,1], index: 3, kind: output, shape index: {}]  }
   0x1   :  { %9 = vsyncpa [#allocation7], 0 }
   0x2   :  { %10 = vsyncpa [#allocation5], 0  ;;  %s210_s12 = smov [#allocation6]   ;;  %s211_s14 = smov [#allocation3]  }
   0x3   :  { %s27_s13 = sshll.u32 %s210_s12, 4  ;;  %s17_s15 = sshll.u32 %s211_s14, 4  ;;  %s28_s13 = int_to_ptr.vmem [resolvable:$true] %s27_s13  ;;  %s18_s15 = int_to_ptr.vmem [resolvable:$true] %s17_s15 }
   0x4   :  { %s116_s18 = scalar_lea.hbm %s287_s1, 128 }
   0x5   :  { %p117_p0 = scmp.ne.s32.totalorder %s287_s1, %s116_s18  ;;  %p120_p1 = scmp.lt.u32.totalorder %s116_s18, %s287_s1 }
   0x7   :  { %p122_p2 = pnand %p120_p1, %p117_p0 }
   0x9   :  { %125 = shalt.err (!%p122_p2)
}
   0xa   :  { %s126_s23 = scalar_lea.vmem %s28_s13, 128  ;;  %p131_p4 = scmp.lt.s32.totalorder %s28_s13, %s28_s13 }
   0xb   :  { %p127_p3 = scmp.ne.s32.totalorder %s28_s13, %s126_s23  ;;  %p132_p5 = scmp.lt.s32.totalorder %s126_s23, %s126_s23 }
   0xd   :  { %p133_p6 = por %p132_p5, %p131_p4 }
   0xf   :  { %p134_p7 = pnand %p133_p6, %p127_p3 }
  0x11   :  { %137 = shalt.err (!%p134_p7)
}
  0x12   :  { %30 = dma.hbm_to_vmem [thread:$0]  %s287_s1, 128, %s28_s13, [#allocation7]  }
  0x13   :  { %s138_s28 = scalar_lea.hbm %s286_s0, 128 }
  0x14   :  { %p139_p8 = scmp.ne.s32.totalorder %s286_s0, %s138_s28  ;;  %p142_p9 = scmp.lt.u32.totalorder %s138_s28, %s286_s0 }
  0x16   :  { %p144_p10 = pnand %p142_p9, %p139_p8 }
  0x18   :  { %147 = shalt.err (!%p144_p10)
}
  0x19   :  { %s148_s6 = scalar_lea.vmem %s18_s15, 128  ;;  %p153_p12 = scmp.lt.s32.totalorder %s18_s15, %s18_s15 }
  0x1a   :  { %p149_p11 = scmp.ne.s32.totalorder %s18_s15, %s148_s6  ;;  %p154_p13 = scmp.lt.s32.totalorder %s148_s6, %s148_s6 }
  0x1c   :  { %p155_p0 = por %p154_p13, %p153_p12 }
  0x1e   :  { %p156_p1 = pnand %p155_p0, %p149_p11 }
  0x20   :  { %159 = shalt.err (!%p156_p1)
}
  0x21   :  { %20 = dma.hbm_to_vmem [thread:$0]  %s286_s0, 128, %s18_s15, [#allocation4]  }
  0x22   :  { %s212_s8 = smov [#allocation8]   ;;  %s160_s12 = scalar_lea.hbm %s288_s2, 128 }
  0x23   :  { %s37_s9 = sshll.u32 %s212_s8, 4  ;;  %p161_p2 = scmp.ne.s32.totalorder %s288_s2, %s160_s12  ;;  %s38_s9 = int_to_ptr.vmem [resolvable:$true] %s37_s9 }
  0x24   :  { %p164_p3 = scmp.lt.u32.totalorder %s160_s12, %s288_s2 }
  0x26   :  { %p166_p4 = pnand %p164_p3, %p161_p2 }
  0x28   :  { %169 = shalt.err (!%p166_p4)
}
  0x29   :  { %s170_s18 = scalar_lea.vmem %s38_s9, 128  ;;  %p175_p6 = scmp.lt.s32.totalorder %s38_s9, %s38_s9 }
  0x2a   :  { %p171_p5 = scmp.ne.s32.totalorder %s38_s9, %s170_s18  ;;  %p176_p7 = scmp.lt.s32.totalorder %s170_s18, %s170_s18 }
  0x2c   :  { %p177_p8 = por %p176_p7, %p175_p6 }
  0x2e   :  { %p178_p9 = pnand %p177_p8, %p171_p5 }
  0x30   :  { %181 = shalt.err (!%p178_p9)
}
  0x31   :  { %40 = dma.hbm_to_vmem [thread:$0]  %s288_s2, 128, %s38_s9, [#allocation7]  }
  0x32   :  { %204 = dma.done.wait [#allocation4], 128  }
  0x33   :  { %205 = vsyncadd [#allocation4], 4294967168 }
  0x34   :  { %206 = dma.done.wait [#allocation7], 256  }
  0x35   :  { %207 = vsyncadd [#allocation7], 4294967040  ;;  %v56_v0 = vld [vmem:[#allocation3] sm:$0xff]  ;;  %v57_v1 = vld [vmem:[#allocation6] sm:$0xff]  ;;  %vm62_vm0 = vcmask 130048   ;;  %vm54_vm1 = vcmask 0  }
  0x36   :  { %v58_v2 = vld [vmem:[#allocation8] sm:$0xff]  ;;  %v59_v3 = vsub.f32 %v56_v0, %v57_v1  ;;  %v213_v9 = vmov 0.0   ;;  %s214_s2 = smov [#allocation9]  }
  0x37   :  { %v60_v4 = vsub.f32 %v56_v0, %v58_v2  ;;  %55 = vst.msk [vmem:[#allocation2] sm:$0x1] %vm54_vm1, %v213_v9  ;;  %s101_s19 = sshll.u32 %s214_s2, 4  ;;  %s102_s19 = int_to_ptr.vmem [resolvable:$true] %s101_s19 }
  0x38   :  { %v61_v5 = vmul.f32 %v59_v3, %v59_v3  ;;  %s182_s20 = scalar_lea.vmem %s102_s19, 16  ;;  %s186_s21 = scalar_lea.vmem %s102_s19, 32 }
  0x39   :  { %v66_v6 = vmul.f32 %v60_v4, %v60_v4  ;;  %p183_p10 = scmp.ne.s32.totalorder %s102_s19, %s182_s20  ;;  %p187_p11 = scmp.lt.s32.totalorder %s102_s19, %s102_s19 }
  0x3a   :  { %v63_v7 = vsel %vm62_vm0, %v61_v5, 0.0  ;;  %p188_p12 = scmp.lt.s32.totalorder %s186_s21, %s182_s20 }
  0x3b   :  { %64 = vadd.xlane.f32.xlu0 %v63_v7  ;;  %v67_v8 = vsel %vm62_vm0, %v66_v6, 0.0 }
  0x3c   :  { %p189_p13 = por %p188_p12, %p187_p11 }
  0x3e   :  { %v80_v20 = vld [vmem:[#allocation2] sm:$0x1]  ;;  %p190_p0 = pnand %p189_p13, %p183_p10 }
  0x3f   :  { %68 = vadd.xlane.f32.xlu0 %v67_v8 }
  0xc8   :  { %v65_v10 = vpop.xlane.xlu0 %64 }
  0xcc   :  { %v69_v11 = vpop.xlane.xlu0 %68 }
  0xcd   :  { %v70_v12 = vsub.f32 %v65_v10, %v69_v11 }
  0xcf   :  { %v71_v13 = vadd.f32 1.0, %v70_v12 }
  0xd1   :  { %v72_v14 = vmax.f32 %v71_v13, 0.0 }
  0xd3   :  { %v81_v15 = vrot.slane %v72_v14, 4 }
  0xd5   :  { %v82_v16 = vadd.f32 %v81_v15, %v72_v14 }
  0xd7   :  { %v83_v17 = vrot.slane %v82_v16, 2 }
  0xd9   :  { %v84_v18 = vadd.f32 %v83_v17, %v82_v16 }
  0xdb   :  { %v85_v19 = vrot.slane %v84_v18, 1 }
  0xdd   :  { %v86_v21 = vadd.f32 %v85_v19, %v84_v18 }
  0xdf   :  { %v87_v22 = vadd.f32 %v86_v21, %v80_v20 }
  0xe1   :  { %89 = vst.msk [vmem:[#allocation2] sm:$0x1] %vm54_vm1, %v87_v22 }
  0xe8   :  { %v93_v23 = vld [vmem:[#allocation2] sm:$0x1] }
  0xe9   :  { %94 = vst.msk [vmem:[#allocation9] sm:$0x1] %vm54_vm1, %v93_v23 }
  0xea   :  { %193 = shalt.err (!%p190_p0)
}
  0xeb   :  { %s194_s24 = scalar_lea.hbm %s289_s3, 16 }
  0xec   :  { %p195_p1 = scmp.ne.s32.totalorder %s289_s3, %s194_s24  ;;  %p198_p2 = scmp.lt.u32.totalorder %s194_s24, %s289_s3 }
  0xee   :  { %p200_p3 = pnand %p198_p2, %p195_p1 }
  0xf0   :  { %203 = shalt.err (!%p200_p3)
}
  0xf1   :  { %104 = dma.vmem_to_hbm [thread:$0]  %s102_s19, 16, %s289_s3, [#allocation5]  }
  0xf2   :  { %208 = dma.done.wait [#allocation5], 16  }
  0xf3   :  { %209 = vsyncadd [#allocation5], 4294967280 }
  0xf4   :  { %108 = vsyncpa [#allocation4], 1 }
  0xf5   :  { %109 = vsyncpa [#allocation7], 1 }
  0xf6   :  { %110 = vsyncpa [#allocation5], 1 }

</bundles_post_ra>
